<compile_context>
chip_gen: v7x
topology: tpu7x:2x2x1
jax: 0.10.0
libtpu: 0.0.40
codegen_flags: <defaults>
</compile_context>

<pallas_src>
import math
import functools

import jax
import jax.numpy as jnp
from jax.experimental import pallas as pl
from jax.experimental.pallas import tpu as pltpu


def _round_up(x, m):
    return (x + m - 1) // m * m


def _layernorm(x, w, b, eps=1e-5):
    mu = jnp.mean(x, axis=-1, keepdims=True)
    var = jnp.mean((x - mu) ** 2, axis=-1, keepdims=True)  # biased var, like PyTorch
    return (x - mu) * jax.lax.rsqrt(var + eps) * w + b


def fused_encoder_kernel(
    x_ref,       # (TB, S, D)    input sequences for this batch block
    in_w_ref,    # (1, D, 3D)    pre-transposed in_proj weight (q rows pre-scaled), bf16
    out_w_ref,   # (1, D, D)     pre-transposed out_proj weight, bf16
    lin1_w_ref,  # (1, D, F)     pre-transposed, bf16
    lin2_w_ref,  # (1, F, D)     pre-transposed, bf16
    vecs_ref,    # (1, 8, Vmax)  packed f32 vectors (biases / LN params)
    o_ref,       # (TB, S, D)
    act_ref,     # (TB*S, D) f32 VMEM scratch, resident across the layer axis
    *,
    nhead,
):
    layer = pl.program_id(1)
    n_layers = pl.num_programs(1)

    TB, S, D = x_ref.shape
    F = lin1_w_ref.shape[-1]
    H = nhead
    Dh = D // H
    M = TB * S
    mm = in_w_ref.dtype            # matmul operand dtype (bf16)

    @pl.when(layer == 0)
    def _():
        for b in range(TB):
            act_ref[b * S:(b + 1) * S, :] = x_ref[b].astype(jnp.float32)

    x = act_ref[...]                                  # (M, D) f32

    # packed per-layer vectors (f32), sliced by static lane/sublane offsets
    vecs = vecs_ref[0]                                # (8, Vmax)
    in_b,   out_b  = vecs[0:1, :3 * D], vecs[1:2, :D]
    ln1_w,  ln1_b  = vecs[2:3, :D],     vecs[3:4, :D]
    lin1_b, lin2_b = vecs[4:5, :F],     vecs[5:6, :D]
    ln2_w,  ln2_b  = vecs[6:7, :D],     vecs[7:8, :D]

    # ---- self attention (MultiheadAttention, eval mode, no mask) ----
    qkv = jnp.dot(x.astype(mm), in_w_ref[0],
                  preferred_element_type=jnp.float32) + in_b     # (M, 3D) f32

    def split(t):  # (M, D) f32 -> (TB*H, S, Dh): batch index = b*H + h
        parts = [t[b * S:(b + 1) * S, h * Dh:(h + 1) * Dh][None]
                 for b in range(TB) for h in range(H)]
        return parts[0] if len(parts) == 1 else jnp.concatenate(parts, axis=0)

    q3 = split(qkv[:, :D]).astype(mm)       # scale already folded into W_q / b_q
    k3 = split(qkv[:, D:2 * D]).astype(mm)
    v3 = split(qkv[:, 2 * D:]).astype(mm)

    s = jnp.einsum("bqd,bkd->bqk", q3, k3,
                   preferred_element_type=jnp.float32)           # (TB*H, S, S)
    s = s - jnp.max(s, axis=-1, keepdims=True)
    # TODO(synk): on v6e/v7x a bf16 exp (f32 denominator accumulation) would
    # relieve the EUP slot; kept f32 pending a bundle-dump check & numerics.
    p = jnp.exp(s)
    p = p * pl.reciprocal(jnp.sum(p, axis=-1, keepdims=True), approx=True)

    ctx = jnp.einsum("bqk,bkd->bqd", p.astype(mm), v3,
                     preferred_element_type=jnp.float32)         # (TB*H, S, Dh)

    # merge heads back onto the lane axis, then ONE D-wide out_proj matmul
    rows = []
    for b in range(TB):
        heads = [ctx[b * H + h] for h in range(H)]
        rows.append(heads[0] if H == 1 else jnp.concatenate(heads, axis=-1))
    ctx2 = rows[0] if TB == 1 else jnp.concatenate(rows, axis=0)  # (M, D) f32
    attn = jnp.dot(ctx2.astype(mm), out_w_ref[0],
                   preferred_element_type=jnp.float32) + out_b    # (M, D)

    # ---- residual + LayerNorm 1 (post-norm), f32 ----
    y = _layernorm(x + attn, ln1_w, ln1_b)

    # ---- feed-forward: linear -> ReLU -> linear ----
    h1 = jnp.dot(y.astype(mm), lin1_w_ref[0],
                 preferred_element_type=jnp.float32) + lin1_b
    h1 = jnp.maximum(h1, 0.0).astype(mm)      # cast early: halve (M,F) live range
    h2 = jnp.dot(h1, lin2_w_ref[0],
                 preferred_element_type=jnp.float32) + lin2_b

    # ---- residual + LayerNorm 2, f32 ----
    z = _layernorm(y + h2, ln2_w, ln2_b)

    @pl.when(layer < n_layers - 1)
    def _():
        act_ref[...] = z                      # skip the redundant store on last layer

    @pl.when(layer == n_layers - 1)
    def _():
        for b in range(TB):
            o_ref[b] = z[b * S:(b + 1) * S, :].astype(o_ref.dtype)

    # TODO(synk): dropout is stochastic; implemented as eval-mode identity.
    # TODO(synk): for large S, replace the dense (TB*H,S,S) scores with a
    # KV-tiled online-softmax (flash) loop; for large D/F on v7x (64 MiB VMEM),
    # add an F-tiled grid axis for the FFN weights.


WEIGHT_KEYS = ("in_w", "out_w", "lin1_w", "lin2_w", "vecs")


def _prep_layer(p, nhead, mm_dtype, vmax):
    """One-time host-side layout prep: PyTorch layout -> kernel layout."""
    d_model = p["out_w"].shape[0]
    dh = d_model // nhead
    scale = 1.0 / math.sqrt(dh)
    # fold 1/sqrt(Dh) into the q third of in_proj weight & bias
    row_scale = jnp.concatenate(
        [jnp.full((d_model,), scale, jnp.float32),
         jnp.ones((2 * d_model,), jnp.float32)])
    in_w = (p["in_w"] * row_scale[:, None]).T.astype(mm_dtype)   # (D, 3D)
    in_b = (p["in_b"] * row_scale).astype(jnp.float32)           # (3D,)

    def pad(v):
        v = v.astype(jnp.float32)
        return jnp.pad(v, (0, vmax - v.shape[0]))

    vecs = jnp.stack([pad(in_b), pad(p["out_b"]),
                      pad(p["ln1_w"]), pad(p["ln1_b"]),
                      pad(p["lin1_b"]), pad(p["lin2_b"]),
                      pad(p["ln2_w"]), pad(p["ln2_b"])], axis=0)  # (8, Vmax)
    return {
        "in_w":   in_w,
        "out_w":  p["out_w"].T.astype(mm_dtype),                  # (D, D)
        "lin1_w": p["lin1_w"].T.astype(mm_dtype),                 # (D, F)
        "lin2_w": p["lin2_w"].T.astype(mm_dtype),                 # (F, D)
        "vecs":   vecs,
    }


def _physical_vmem_bytes():
    try:
        info = pltpu.get_tpu_info()
        for name in ("vmem_capacity_bytes", "vmem_size_bytes", "vmem_bytes"):
            v = getattr(info, name, None)
            if isinstance(v, int) and v > 0:
                return v
    except Exception:
        pass
    return 64 * 1024 * 1024      # conservative fallback (v7x-sized)


def _per_step_act_bytes(tb, S, D, F, H):
    """Rough f32 intermediate + scratch + I/O bytes for a TB-sized batch block."""
    M = tb * S
    interm = 4 * (M * 3 * D + 2 * tb * H * S * S + M * F + 6 * M * D)
    scratch = 4 * M * D
    io = 2 * 2 * tb * S * D * 4          # x + out, double-buffered
    return interm + scratch + io


def _choose_batch_block(B, S, D, F, H, budget_bytes):
    best = 1
    for tb in range(1, B + 1):
        if B % tb:
            continue
        if B >= 2 and B // tb < 2:
            continue                     # keep >=2 parallel steps (v7x megacore)
        if _per_step_act_bytes(tb, S, D, F, H) <= budget_bytes:
            best = tb
    return best


def transformer_encoder(x, layer_params, nhead, mm_dtype=jnp.bfloat16,
                        batch_first=False):
    """Matches PyTorch TransformerEncoder.forward: x is (S, B, d_model) by default.

    Pass batch_first=True with (B, S, d_model) data to skip the two wrapper-side
    HBM transpose passes.
    """
    x_bsd = x if batch_first else jnp.transpose(x, (1, 0, 2))     # (B, S, D)
    B, S, D = x_bsd.shape
    L = len(layer_params)
    F = layer_params[0]["lin1_w"].shape[0]
    assert D % nhead == 0 and L >= 1

    mm_bytes = jnp.dtype(mm_dtype).itemsize
    Vmax = _round_up(max(3 * D, F), 128)

    # --- VMEM budgeting (per-generation physical size) ---
    phys = _physical_vmem_bytes()
    w_layer_bytes = (D * 3 * D + D * D + 2 * D * F) * mm_bytes + 8 * Vmax * 4
    act_budget = max(2 * 1024 * 1024, int(0.6 * phys) - 2 * w_layer_bytes)
    TB = _choose_batch_block(B, S, D, F, nhead, act_budget)
    est = 2 * w_layer_bytes + _per_step_act_bytes(TB, S, D, F, nhead)
    vmem_limit = int(min(max(2 * est, 16 * 1024 * 1024), 0.75 * phys))

    # --- weight prep & stacking over layers ---
    prepped = [_prep_layer(p, nhead, mm_dtype, Vmax) for p in layer_params]
    stacked = {k: jnp.stack([pp[k] for pp in prepped], axis=0) for k in WEIGHT_KEYS}
    weight_args = [stacked[k] for k in WEIGHT_KEYS]

    in_specs = [pl.BlockSpec((TB, S, D), lambda b, l: (b, 0, 0))]
    in_specs += [pl.BlockSpec((1,) + w.shape[1:], lambda b, l: (l, 0, 0))
                 for w in weight_args]

    out = pl.pallas_call(
        functools.partial(fused_encoder_kernel, nhead=nhead),
        out_shape=jax.ShapeDtypeStruct((B, S, D), x.dtype),
        grid_spec=pltpu.PrefetchScalarGridSpec(
            num_scalar_prefetch=0,
            grid=(B // TB, L),           # batch blocks parallel, layer axis inner
            in_specs=in_specs,
            out_specs=pl.BlockSpec((TB, S, D), lambda b, l: (b, 0, 0)),
            scratch_shapes=[pltpu.VMEM((TB * S, D), jnp.float32)],
        ),
        compiler_params=pltpu.CompilerParams(
            dimension_semantics=("parallel", "arbitrary"),
            vmem_limit_bytes=vmem_limit,
        ),
    )(x_bsd, *weight_args)

    return out if batch_first else jnp.transpose(out, (1, 0, 2))  # back to (S, B, D)


def init_layer_params(key, d_model, dim_feedforward):
    ks = jax.random.split(key, 6)

    def xavier(k, shape):
        fan_in, fan_out = shape[1], shape[0]
        lim = math.sqrt(6.0 / (fan_in + fan_out))
        return jax.random.uniform(k, shape, jnp.float32, -lim, lim)

    return {
        "in_w":  xavier(ks[0], (3 * d_model, d_model)),
        "in_b":  jnp.zeros((3 * d_model,), jnp.float32),
        "out_w": xavier(ks[1], (d_model, d_model)),
        "out_b": jnp.zeros((d_model,), jnp.float32),
        "ln1_w": jnp.ones((d_model,), jnp.float32),
        "ln1_b": jnp.zeros((d_model,), jnp.float32),
        "lin1_w": xavier(ks[2], (dim_feedforward, d_model)),
        "lin1_b": 0.01 * jax.random.normal(ks[3], (dim_feedforward,), jnp.float32),
        "lin2_w": xavier(ks[4], (d_model, dim_feedforward)),
        "lin2_b": 0.01 * jax.random.normal(ks[5], (d_model,), jnp.float32),
        "ln2_w": jnp.ones((d_model,), jnp.float32),
        "ln2_b": jnp.zeros((d_model,), jnp.float32),
    }


if __name__ == "__main__":
    d_model = 32
    nhead = 4
    dim_feedforward = 64
    num_trans_encoders = 2
    seq, batch = 8, 2

    root = jax.random.PRNGKey(0)
    kx, *kls = jax.random.split(root, 1 + num_trans_encoders)

    # PyTorch layout: (S, B, d_model)
    x = jax.random.normal(kx, (seq, batch, d_model), dtype=jnp.float32)
    layer_params = [init_layer_params(k, d_model, dim_feedforward) for k in kls]

    out = transformer_encoder(x, layer_params, nhead)
    out = jax.block_until_ready(out)
    assert out.shape == (seq, batch, d_model)
    assert bool(jnp.all(jnp.isfinite(out)))
    print("KERNEL_OK")
</pallas_src>

<mosaic_0001>
module attributes {stable_mosaic.version = 11 : i64} {
  func.func @fused_encoder_kernel(%arg0: i32, %arg1: i32, %arg2: memref<1x8x32xf32, #tpu.memory_space<vmem>>, %arg3: memref<1x32x96xbf16, #tpu.memory_space<vmem>>, %arg4: memref<1x32x32xbf16, #tpu.memory_space<vmem>>, %arg5: memref<1x32x64xbf16, #tpu.memory_space<vmem>>, %arg6: memref<1x64x32xbf16, #tpu.memory_space<vmem>>, %arg7: memref<1x8x128xf32, #tpu.memory_space<vmem>>, %arg8: memref<1x8x32xf32, #tpu.memory_space<vmem>>, %arg9: memref<8x32xf32, #tpu.memory_space<vmem>>) attributes {dimension_semantics = [#tpu.dimension_semantics<parallel>, #tpu.dimension_semantics<arbitrary>], iteration_bounds = array<i64: 2, 2>, scalar_prefetch = 0 : i64, scratch_operands = 1 : i64, tpu.core_type = #tpu.core_type<tc>, window_params = [{transform_indices = @transform_0, window_bounds = array<i64: 1, 8, 32>}, {transform_indices = @transform_1, window_bounds = array<i64: 1, 32, 96>}, {transform_indices = @transform_2, window_bounds = array<i64: 1, 32, 32>}, {transform_indices = @transform_3, window_bounds = array<i64: 1, 32, 64>}, {transform_indices = @transform_4, window_bounds = array<i64: 1, 64, 32>}, {transform_indices = @transform_5, window_bounds = array<i64: 1, 8, 128>}, {transform_indices = @transform_6, window_bounds = array<i64: 1, 8, 32>}]} {
    %c0_i32 = arith.constant 0 : i32
    %0 = arith.cmpi eq, %arg1, %c0_i32 : i32
    %1 = arith.extui %0 : i1 to i32
    %c0_i32_0 = arith.constant 0 : i32
    %2 = arith.cmpi ne, %1, %c0_i32_0 : i32
    scf.if %2 {
      %c0_38 = arith.constant 0 : index
      %c0_39 = arith.constant 0 : index
      %c0_40 = arith.constant 0 : index
      %147 = vector.load %arg2[%c0_38, %c0_39, %c0_40] : memref<1x8x32xf32, #tpu.memory_space<vmem>>, vector<1x8x32xf32>
      %148 = vector.shape_cast %147 : vector<1x8x32xf32> to vector<8x32xf32>
      %c0_41 = arith.constant 0 : index
      %c0_42 = arith.constant 0 : index
      %149 = vector.load %arg9[%c0_41, %c0_42] : memref<8x32xf32, #tpu.memory_space<vmem>>, vector<8x32xf32>
      tpu.vector_store %arg9[%c0_41, %c0_42], %148 {strides = array<i32>} : memref<8x32xf32, #tpu.memory_space<vmem>>, vector<8x32xf32>,
    } else {
    }
    %c0 = arith.constant 0 : index
    %c0_1 = arith.constant 0 : index
    %3 = vector.load %arg9[%c0, %c0_1] : memref<8x32xf32, #tpu.memory_space<vmem>>, vector<8x32xf32>
    %c0_2 = arith.constant 0 : index
    %c0_3 = arith.constant 0 : index
    %c0_4 = arith.constant 0 : index
    %4 = vector.load %arg7[%c0_2, %c0_3, %c0_4] : memref<1x8x128xf32, #tpu.memory_space<vmem>>, vector<1x8x128xf32>
    %5 = vector.shape_cast %4 : vector<1x8x128xf32> to vector<8x128xf32>
    %6 = vector.extract_strided_slice %5 {offsets = [0, 0], sizes = [1, 96], strides = [1, 1]} : vector<8x128xf32> to vector<1x96xf32>
    %7 = vector.extract_strided_slice %5 {offsets = [1, 0], sizes = [1, 32], strides = [1, 1]} : vector<8x128xf32> to vector<1x32xf32>
    %8 = vector.extract_strided_slice %5 {offsets = [2, 0], sizes = [1, 32], strides = [1, 1]} : vector<8x128xf32> to vector<1x32xf32>
    %9 = vector.extract_strided_slice %5 {offsets = [3, 0], sizes = [1, 32], strides = [1, 1]} : vector<8x128xf32> to vector<1x32xf32>
    %10 = vector.extract_strided_slice %5 {offsets = [4, 0], sizes = [1, 64], strides = [1, 1]} : vector<8x128xf32> to vector<1x64xf32>
    %11 = vector.extract_strided_slice %5 {offsets = [5, 0], sizes = [1, 32], strides = [1, 1]} : vector<8x128xf32> to vector<1x32xf32>
    %12 = vector.extract_strided_slice %5 {offsets = [6, 0], sizes = [1, 32], strides = [1, 1]} : vector<8x128xf32> to vector<1x32xf32>
    %13 = vector.extract_strided_slice %5 {offsets = [7, 0], sizes = [1, 32], strides = [1, 1]} : vector<8x128xf32> to vector<1x32xf32>
    %14 = arith.truncf %3 : vector<8x32xf32> to vector<8x32xbf16>
    %c0_5 = arith.constant 0 : index
    %c0_6 = arith.constant 0 : index
    %c0_7 = arith.constant 0 : index
    %15 = vector.load %arg3[%c0_5, %c0_6, %c0_7] : memref<1x32x96xbf16, #tpu.memory_space<vmem>>, vector<1x32x96xbf16>
    %16 = vector.shape_cast %15 : vector<1x32x96xbf16> to vector<32x96xbf16>
    %cst = arith.constant dense<0.000000e+00> : vector<8x96xf32>
    %17 = tpu.matmul %14, %16, %cst {dimension_numbers = #tpu.dot_dimension_numbers<[1], [0], [0], [1], [0, 0, 1, 1], [], []>} : vector<8x32xbf16>, vector<32x96xbf16>, vector<8x96xf32> -> vector<8x96xf32>
    %18 = vector.broadcast %6 : vector<1x96xf32> to vector<8x96xf32>
    %19 = arith.addf %17, %18 : vector<8x96xf32>
    %20 = vector.extract_strided_slice %19 {offsets = [0, 0], sizes = [8, 32], strides = [1, 1]} : vector<8x96xf32> to vector<8x32xf32>
    %21 = vector.extract_strided_slice %20 {offsets = [0, 0], sizes = [8, 8], strides = [1, 1]} : vector<8x32xf32> to vector<8x8xf32>
    %22 = vector.shape_cast %21 : vector<8x8xf32> to vector<1x8x8xf32>
    %23 = vector.extract_strided_slice %20 {offsets = [0, 8], sizes = [8, 8], strides = [1, 1]} : vector<8x32xf32> to vector<8x8xf32>
    %24 = vector.shape_cast %23 : vector<8x8xf32> to vector<1x8x8xf32>
    %25 = vector.extract_strided_slice %20 {offsets = [0, 16], sizes = [8, 8], strides = [1, 1]} : vector<8x32xf32> to vector<8x8xf32>
    %26 = vector.shape_cast %25 : vector<8x8xf32> to vector<1x8x8xf32>
    %27 = vector.extract_strided_slice %20 {offsets = [0, 24], sizes = [8, 8], strides = [1, 1]} : vector<8x32xf32> to vector<8x8xf32>
    %28 = vector.shape_cast %27 : vector<8x8xf32> to vector<1x8x8xf32>
    %29 = tpu.concatenate %22, %24, %26, %28 in 0 : vector<1x8x8xf32>, vector<1x8x8xf32>, vector<1x8x8xf32>, vector<1x8x8xf32> -> vector<4x8x8xf32>
    %30 = arith.truncf %29 : vector<4x8x8xf32> to vector<4x8x8xbf16>
    %31 = vector.extract_strided_slice %19 {offsets = [0, 32], sizes = [8, 32], strides = [1, 1]} : vector<8x96xf32> to vector<8x32xf32>
    %32 = vector.extract_strided_slice %31 {offsets = [0, 0], sizes = [8, 8], strides = [1, 1]} : vector<8x32xf32> to vector<8x8xf32>
    %33 = vector.shape_cast %32 : vector<8x8xf32> to vector<1x8x8xf32>
    %34 = vector.extract_strided_slice %31 {offsets = [0, 8], sizes = [8, 8], strides = [1, 1]} : vector<8x32xf32> to vector<8x8xf32>
    %35 = vector.shape_cast %34 : vector<8x8xf32> to vector<1x8x8xf32>
    %36 = vector.extract_strided_slice %31 {offsets = [0, 16], sizes = [8, 8], strides = [1, 1]} : vector<8x32xf32> to vector<8x8xf32>
    %37 = vector.shape_cast %36 : vector<8x8xf32> to vector<1x8x8xf32>
    %38 = vector.extract_strided_slice %31 {offsets = [0, 24], sizes = [8, 8], strides = [1, 1]} : vector<8x32xf32> to vector<8x8xf32>
    %39 = vector.shape_cast %38 : vector<8x8xf32> to vector<1x8x8xf32>
    %40 = tpu.concatenate %33, %35, %37, %39 in 0 : vector<1x8x8xf32>, vector<1x8x8xf32>, vector<1x8x8xf32>, vector<1x8x8xf32> -> vector<4x8x8xf32>
    %41 = arith.truncf %40 : vector<4x8x8xf32> to vector<4x8x8xbf16>
    %42 = vector.extract_strided_slice %19 {offsets = [0, 64], sizes = [8, 32], strides = [1, 1]} : vector<8x96xf32> to vector<8x32xf32>
    %43 = vector.extract_strided_slice %42 {offsets = [0, 0], sizes = [8, 8], strides = [1, 1]} : vector<8x32xf32> to vector<8x8xf32>
    %44 = vector.shape_cast %43 : vector<8x8xf32> to vector<1x8x8xf32>
    %45 = vector.extract_strided_slice %42 {offsets = [0, 8], sizes = [8, 8], strides = [1, 1]} : vector<8x32xf32> to vector<8x8xf32>
    %46 = vector.shape_cast %45 : vector<8x8xf32> to vector<1x8x8xf32>
    %47 = vector.extract_strided_slice %42 {offsets = [0, 16], sizes = [8, 8], strides = [1, 1]} : vector<8x32xf32> to vector<8x8xf32>
    %48 = vector.shape_cast %47 : vector<8x8xf32> to vector<1x8x8xf32>
    %49 = vector.extract_strided_slice %42 {offsets = [0, 24], sizes = [8, 8], strides = [1, 1]} : vector<8x32xf32> to vector<8x8xf32>
    %50 = vector.shape_cast %49 : vector<8x8xf32> to vector<1x8x8xf32>
    %51 = tpu.concatenate %44, %46, %48, %50 in 0 : vector<1x8x8xf32>, vector<1x8x8xf32>, vector<1x8x8xf32>, vector<1x8x8xf32> -> vector<4x8x8xf32>
    %52 = arith.truncf %51 : vector<4x8x8xf32> to vector<4x8x8xbf16>
    "tpu.trace_start"() <{level = 10 : i32, message = "bqd,bkd->bqk"}> : () -> ()
    %cst_8 = arith.constant dense<0.000000e+00> : vector<4x8x8xf32>
    %53 = tpu.matmul %30, %41, %cst_8 {dimension_numbers = #tpu.dot_dimension_numbers<[2], [2], [1], [1], [0, 0, 0, 1, 1, 1], [0], [0]>} : vector<4x8x8xbf16>, vector<4x8x8xbf16>, vector<4x8x8xf32> -> vector<4x8x8xf32>
    "tpu.trace_stop"() : () -> ()
    %cst_9 = arith.constant dense<0xFF800000> : vector<4x8xf32>
    %54 = vector.multi_reduction <maximumf>, %53, %cst_9 [2] : vector<4x8x8xf32> to vector<4x8xf32>
    %55 = vector.shape_cast %54 : vector<4x8xf32> to vector<4x8x1xf32>
    %56 = vector.broadcast %55 : vector<4x8x1xf32> to vector<4x8x8xf32>
    %57 = arith.subf %53, %56 : vector<4x8x8xf32>
    %58 = math.exp %57 : vector<4x8x8xf32>
    %cst_10 = arith.constant dense<0.000000e+00> : vector<4x8xf32>
    %59 = vector.multi_reduction <add>, %58, %cst_10 [2] : vector<4x8x8xf32> to vector<4x8xf32>
    %60 = vector.shape_cast %59 : vector<4x8xf32> to vector<4x8x1xf32>
    %61 = tpu.reciprocal %60 {approx = true} : vector<4x8x1xf32> -> vector<4x8x1xf32>
    %62 = vector.broadcast %61 : vector<4x8x1xf32> to vector<4x8x8xf32>
    %63 = arith.mulf %58, %62 : vector<4x8x8xf32>
    %64 = arith.truncf %63 : vector<4x8x8xf32> to vector<4x8x8xbf16>
    "tpu.trace_start"() <{level = 10 : i32, message = "bqk,bkd->bqd"}> : () -> ()
    %cst_11 = arith.constant dense<0.000000e+00> : vector<4x8x8xf32>
    %65 = tpu.matmul %64, %52, %cst_11 {dimension_numbers = #tpu.dot_dimension_numbers<[2], [1], [1], [2], [0, 0, 0, 1, 1, 2], [0], [0]>} : vector<4x8x8xbf16>, vector<4x8x8xbf16>, vector<4x8x8xf32> -> vector<4x8x8xf32>
    "tpu.trace_stop"() : () -> ()
    %66 = vector.extract_strided_slice %65 {offsets = [0, 0, 0], sizes = [1, 8, 8], strides = [1, 1, 1]} : vector<4x8x8xf32> to vector<1x8x8xf32>
    %67 = vector.shape_cast %66 : vector<1x8x8xf32> to vector<8x8xf32>
    %68 = vector.extract_strided_slice %65 {offsets = [1, 0, 0], sizes = [1, 8, 8], strides = [1, 1, 1]} : vector<4x8x8xf32> to vector<1x8x8xf32>
    %69 = vector.shape_cast %68 : vector<1x8x8xf32> to vector<8x8xf32>
    %70 = vector.extract_strided_slice %65 {offsets = [2, 0, 0], sizes = [1, 8, 8], strides = [1, 1, 1]} : vector<4x8x8xf32> to vector<1x8x8xf32>
    %71 = vector.shape_cast %70 : vector<1x8x8xf32> to vector<8x8xf32>
    %72 = vector.extract_strided_slice %65 {offsets = [3, 0, 0], sizes = [1, 8, 8], strides = [1, 1, 1]} : vector<4x8x8xf32> to vector<1x8x8xf32>
    %73 = vector.shape_cast %72 : vector<1x8x8xf32> to vector<8x8xf32>
    %74 = tpu.concatenate %67, %69, %71, %73 in 1 : vector<8x8xf32>, vector<8x8xf32>, vector<8x8xf32>, vector<8x8xf32> -> vector<8x32xf32>
    %75 = arith.truncf %74 : vector<8x32xf32> to vector<8x32xbf16>
    %c0_12 = arith.constant 0 : index
    %c0_13 = arith.constant 0 : index
    %c0_14 = arith.constant 0 : index
    %76 = vector.load %arg4[%c0_12, %c0_13, %c0_14] : memref<1x32x32xbf16, #tpu.memory_space<vmem>>, vector<1x32x32xbf16>
    %77 = vector.shape_cast %76 : vector<1x32x32xbf16> to vector<32x32xbf16>
    %cst_15 = arith.constant dense<0.000000e+00> : vector<8x32xf32>
    %78 = tpu.matmul %75, %77, %cst_15 {dimension_numbers = #tpu.dot_dimension_numbers<[1], [0], [0], [1], [0, 0, 1, 1], [], []>} : vector<8x32xbf16>, vector<32x32xbf16>, vector<8x32xf32> -> vector<8x32xf32>
    %79 = vector.broadcast %7 : vector<1x32xf32> to vector<8x32xf32>
    %80 = arith.addf %78, %79 : vector<8x32xf32>
    %81 = arith.addf %3, %80 : vector<8x32xf32>
    %cst_16 = arith.constant dense<0.000000e+00> : vector<8xf32>
    %82 = vector.multi_reduction <add>, %81, %cst_16 [1] : vector<8x32xf32> to vector<8xf32>
    %83 = vector.shape_cast %82 : vector<8xf32> to vector<8x1xf32>
    %cst_17 = arith.constant 3.200000e+01 : f32
    %84 = vector.broadcast %cst_17 : f32 to vector<8x1xf32>
    %85 = arith.divf %83, %84 : vector<8x1xf32>
    %86 = vector.broadcast %85 : vector<8x1xf32> to vector<8x32xf32>
    %87 = arith.subf %81, %86 : vector<8x32xf32>
    %88 = arith.mulf %87, %87 : vector<8x32xf32>
    %cst_18 = arith.constant dense<0.000000e+00> : vector<8xf32>
    %89 = vector.multi_reduction <add>, %88, %cst_18 [1] : vector<8x32xf32> to vector<8xf32>
    %90 = vector.shape_cast %89 : vector<8xf32> to vector<8x1xf32>
    %cst_19 = arith.constant 3.200000e+01 : f32
    %91 = vector.broadcast %cst_19 : f32 to vector<8x1xf32>
    %92 = arith.divf %90, %91 : vector<8x1xf32>
    %93 = vector.broadcast %85 : vector<8x1xf32> to vector<8x32xf32>
    %94 = arith.subf %81, %93 : vector<8x32xf32>
    %cst_20 = arith.constant 9.99999974E-6 : f32
    %95 = vector.broadcast %cst_20 : f32 to vector<8x1xf32>
    %96 = arith.addf %92, %95 : vector<8x1xf32>
    %97 = math.rsqrt %96 : vector<8x1xf32>
    %98 = vector.broadcast %97 : vector<8x1xf32> to vector<8x32xf32>
    %99 = arith.mulf %94, %98 : vector<8x32xf32>
    %100 = vector.broadcast %8 : vector<1x32xf32> to vector<8x32xf32>
    %101 = arith.mulf %99, %100 : vector<8x32xf32>
    %102 = vector.broadcast %9 : vector<1x32xf32> to vector<8x32xf32>
    %103 = arith.addf %101, %102 : vector<8x32xf32>
    %104 = arith.truncf %103 : vector<8x32xf32> to vector<8x32xbf16>
    %c0_21 = arith.constant 0 : index
    %c0_22 = arith.constant 0 : index
    %c0_23 = arith.constant 0 : index
    %105 = vector.load %arg5[%c0_21, %c0_22, %c0_23] : memref<1x32x64xbf16, #tpu.memory_space<vmem>>, vector<1x32x64xbf16>
    %106 = vector.shape_cast %105 : vector<1x32x64xbf16> to vector<32x64xbf16>
    %cst_24 = arith.constant dense<0.000000e+00> : vector<8x64xf32>
    %107 = tpu.matmul %104, %106, %cst_24 {dimension_numbers = #tpu.dot_dimension_numbers<[1], [0], [0], [1], [0, 0, 1, 1], [], []>} : vector<8x32xbf16>, vector<32x64xbf16>, vector<8x64xf32> -> vector<8x64xf32>
    %108 = vector.broadcast %10 : vector<1x64xf32> to vector<8x64xf32>
    %109 = arith.addf %107, %108 : vector<8x64xf32>
    %cst_25 = arith.constant 0.000000e+00 : f32
    %110 = vector.broadcast %cst_25 : f32 to vector<8x64xf32>
    %111 = arith.maximumf %109, %110 : vector<8x64xf32>
    %112 = arith.truncf %111 : vector<8x64xf32> to vector<8x64xbf16>
    %c0_26 = arith.constant 0 : index
    %c0_27 = arith.constant 0 : index
    %c0_28 = arith.constant 0 : index
    %113 = vector.load %arg6[%c0_26, %c0_27, %c0_28] : memref<1x64x32xbf16, #tpu.memory_space<vmem>>, vector<1x64x32xbf16>
    %114 = vector.shape_cast %113 : vector<1x64x32xbf16> to vector<64x32xbf16>
    %cst_29 = arith.constant dense<0.000000e+00> : vector<8x32xf32>
    %115 = tpu.matmul %112, %114, %cst_29 {dimension_numbers = #tpu.dot_dimension_numbers<[1], [0], [0], [1], [0, 0, 1, 1], [], []>} : vector<8x64xbf16>, vector<64x32xbf16>, vector<8x32xf32> -> vector<8x32xf32>
    %116 = vector.broadcast %11 : vector<1x32xf32> to vector<8x32xf32>
    %117 = arith.addf %115, %116 : vector<8x32xf32>
    %118 = arith.addf %103, %117 : vector<8x32xf32>
    %cst_30 = arith.constant dense<0.000000e+00> : vector<8xf32>
    %119 = vector.multi_reduction <add>, %118, %cst_30 [1] : vector<8x32xf32> to vector<8xf32>
    %120 = vector.shape_cast %119 : vector<8xf32> to vector<8x1xf32>
    %cst_31 = arith.constant 3.200000e+01 : f32
    %121 = vector.broadcast %cst_31 : f32 to vector<8x1xf32>
    %122 = arith.divf %120, %121 : vector<8x1xf32>
    %123 = vector.broadcast %122 : vector<8x1xf32> to vector<8x32xf32>
    %124 = arith.subf %118, %123 : vector<8x32xf32>
    %125 = arith.mulf %124, %124 : vector<8x32xf32>
    %cst_32 = arith.constant dense<0.000000e+00> : vector<8xf32>
    %126 = vector.multi_reduction <add>, %125, %cst_32 [1] : vector<8x32xf32> to vector<8xf32>
    %127 = vector.shape_cast %126 : vector<8xf32> to vector<8x1xf32>
    %cst_33 = arith.constant 3.200000e+01 : f32
    %128 = vector.broadcast %cst_33 : f32 to vector<8x1xf32>
    %129 = arith.divf %127, %128 : vector<8x1xf32>
    %130 = vector.broadcast %122 : vector<8x1xf32> to vector<8x32xf32>
    %131 = arith.subf %118, %130 : vector<8x32xf32>
    %cst_34 = arith.constant 9.99999974E-6 : f32
    %132 = vector.broadcast %cst_34 : f32 to vector<8x1xf32>
    %133 = arith.addf %129, %132 : vector<8x1xf32>
    %134 = math.rsqrt %133 : vector<8x1xf32>
    %135 = vector.broadcast %134 : vector<8x1xf32> to vector<8x32xf32>
    %136 = arith.mulf %131, %135 : vector<8x32xf32>
    %137 = vector.broadcast %12 : vector<1x32xf32> to vector<8x32xf32>
    %138 = arith.mulf %136, %137 : vector<8x32xf32>
    %139 = vector.broadcast %13 : vector<1x32xf32> to vector<8x32xf32>
    %140 = arith.addf %138, %139 : vector<8x32xf32>
    %c1_i32 = arith.constant 1 : i32
    %141 = arith.cmpi slt, %arg1, %c1_i32 : i32
    %142 = arith.extui %141 : i1 to i32
    %c0_i32_35 = arith.constant 0 : i32
    %143 = arith.cmpi ne, %142, %c0_i32_35 : i32
    scf.if %143 {
      %c0_38 = arith.constant 0 : index
      %c0_39 = arith.constant 0 : index
      %147 = vector.load %arg9[%c0_38, %c0_39] : memref<8x32xf32, #tpu.memory_space<vmem>>, vector<8x32xf32>
      tpu.vector_store %arg9[%c0_38, %c0_39], %140 {strides = array<i32>} : memref<8x32xf32, #tpu.memory_space<vmem>>, vector<8x32xf32>,
    } else {
    }
    %c1_i32_36 = arith.constant 1 : i32
    %144 = arith.cmpi eq, %arg1, %c1_i32_36 : i32
    %145 = arith.extui %144 : i1 to i32
    %c0_i32_37 = arith.constant 0 : i32
    %146 = arith.cmpi ne, %145, %c0_i32_37 : i32
    scf.if %146 {
      %c0_38 = arith.constant 0 : index
      %c0_39 = arith.constant 0 : index
      %c0_40 = arith.constant 0 : index
      %147 = vector.load %arg8[%c0_38, %c0_39, %c0_40] : memref<1x8x32xf32, #tpu.memory_space<vmem>>, vector<1x8x32xf32>
      %148 = vector.shape_cast %147 : vector<1x8x32xf32> to vector<8x32xf32>
      %149 = vector.shape_cast %140 : vector<8x32xf32> to vector<1x8x32xf32>
      tpu.vector_store %arg8[%c0_38, %c0_39, %c0_40], %149 {strides = array<i32>} : memref<1x8x32xf32, #tpu.memory_space<vmem>>, vector<1x8x32xf32>,
    } else {
    }
    return
  }
  func.func @transform_0(%arg0: i32, %arg1: i32) -> (i32, i32, i32) {
    %c0_i32 = arith.constant 0 : i32
    %c0_i32_0 = arith.constant 0 : i32
    %c0_i32_1 = arith.constant 0 : i32
    return %arg0, %c0_i32, %c0_i32_0 : i32, i32, i32
  }
  func.func @transform_1(%arg0: i32, %arg1: i32) -> (i32, i32, i32) {
    %c0_i32 = arith.constant 0 : i32
    %c0_i32_0 = arith.constant 0 : i32
    %c0_i32_1 = arith.constant 0 : i32
    return %arg1, %c0_i32, %c0_i32_0 : i32, i32, i32
  }
  func.func @transform_2(%arg0: i32, %arg1: i32) -> (i32, i32, i32) {
    %c0_i32 = arith.constant 0 : i32
    %c0_i32_0 = arith.constant 0 : i32
    %c0_i32_1 = arith.constant 0 : i32
    return %arg1, %c0_i32, %c0_i32_0 : i32, i32, i32
  }
  func.func @transform_3(%arg0: i32, %arg1: i32) -> (i32, i32, i32) {
    %c0_i32 = arith.constant 0 : i32
    %c0_i32_0 = arith.constant 0 : i32
    %c0_i32_1 = arith.constant 0 : i32
    return %arg1, %c0_i32, %c0_i32_0 : i32, i32, i32
  }
  func.func @transform_4(%arg0: i32, %arg1: i32) -> (i32, i32, i32) {
    %c0_i32 = arith.constant 0 : i32
    %c0_i32_0 = arith.constant 0 : i32
    %c0_i32_1 = arith.constant 0 : i32
    return %arg1, %c0_i32, %c0_i32_0 : i32, i32, i32
  }
  func.func @transform_5(%arg0: i32, %arg1: i32) -> (i32, i32, i32) {
    %c0_i32 = arith.constant 0 : i32
    %c0_i32_0 = arith.constant 0 : i32
    %c0_i32_1 = arith.constant 0 : i32
    return %arg1, %c0_i32, %c0_i32_0 : i32, i32, i32
  }
  func.func @transform_6(%arg0: i32, %arg1: i32) -> (i32, i32, i32) {
    %c0_i32 = arith.constant 0 : i32
    %c0_i32_0 = arith.constant 0 : i32
    %c0_i32_1 = arith.constant 0 : i32
    return %arg0, %c0_i32, %c0_i32_0 : i32, i32, i32
  }
}

</mosaic_0001>

<bundles_post_ra>
// kernel: tpu_custom_call.1
= control target key start
LH: loop header
LB: loop body
LE: loop exit
PB: predicated region body
PF: predicated region fallthrough
CT: control target
= control target key end

     0   :  { %s2146_s0 = inlined_call_operand.hbm [shape: f32[2,8,32], index: 0, kind: input, shape index: {}]   ;;  %s2147_s1 = inlined_call_operand.vmem [shape: bf16[2,32,96], index: 1, kind: input, shape index: {}]   ;;  %s2148_s2 = inlined_call_operand.vmem [shape: bf16[2,32,32], index: 2, kind: input, shape index: {}]   ;;  %s2149_s3 = inlined_call_operand.vmem [shape: bf16[2,32,64], index: 3, kind: input, shape index: {}]   ;;  %s2150_s4 = inlined_call_operand.vmem [shape: bf16[2,64,32], index: 4, kind: input, shape index: {}]   ;;  %s2151_s5 = inlined_call_operand.vmem [shape: f32[2,8,128], index: 5, kind: input, shape index: {}]   ;;  %s2152_s6 = inlined_call_operand.hbm [shape: f32[2,8,32], index: 6, kind: output, shape index: {}]  }
   0x1   :  { %2161 = sst [smem:[#allocation18_spill]] %s2146_s0 }
   0x2   :  { %11 = vsyncpa [#allocation4], 0 }
   0x3   :  { %13 = vsyncpa [#allocation4 + $0x1], 0 }
   0x4   :  { %14 = vsyncpa [#allocation5], 0 }
   0x5   :  { %16 = vsyncpa [#allocation5 + $0x1], 0  ;;  %s1804_s21 = smov 0   ;;  %s1806_s22 = smov 0  }
   0x6   :  { %s1808_s23 = smov 0   ;;  %s1810_s24 = smov 0  }
   0x7   :  { %s1812_s25 = smov 0   ;;  %s1814_s26 = smov 0  }
   0x8   :  { %s1816_s27 = smov 0   ;;  %s1818_s28 = smov 0  }
   0x9 LB: > { %2162 = sst [smem:[#allocation9_spill]] %s1727_s21  ;;  %s1344_s29 = sadd.s32 4294967295, %s1755_s28   ;;  %s1755_s28 = sphi %s1818_s28, %s22_s28   ;;  %s1751_s27 = sphi %s1816_s27, %s2189_s27   ;;  %s1747_s26 = sphi %s1814_s26, %s2188_s26   ;;  %s1743_s25 = sphi %s1812_s25, %s2187_s25   ;;  %s1739_s24 = sphi %s1810_s24, %s2186_s24   ;;  %s1735_s23 = sphi %s1808_s23, %s2185_s23   ;;  %s1731_s22 = sphi %s1806_s22, %s2184_s22   ;;  %s1727_s21 = sphi %s1804_s21, %s2183_s21  }
   0xa   : > { %2163 = sst [smem:[#allocation10_spill]] %s1731_s22  ;;  %s1345_s30 = sadd.s32 4294967294, %s1755_s28  }
   0xb   : > { %2164 = sst [smem:[#allocation11_spill]] %s1735_s23  ;;  %s31_s7 = sadd.s32 1, %s1747_s26 }
   0xc   : > { %2165 = sst [smem:[#allocation12_spill]] %s1747_s26  ;;  %s34_s8 = sadd.s32 1, %s1751_s27 }
   0xd   : > { %2166 = sst [smem:[#allocation13_spill]] %s1751_s27  ;;  %p32_p0 = scmp.ge.s32.totalorder %s31_s7, 2 }
   0xe   : > { %s41_s9 = sadd.s32 1, %s1735_s23  ;;  %p48_p1 = scmp.ne.s32.totalorder %s1735_s23, %s1731_s22 }
   0xf   : > { %p49_p2 = scmp.eq.s32.totalorder %s1755_s28, 0  ;;  %s2191_s7 = smov (%p32_p0, %s31_s7), 0 }
  0x10   : > { %2167 = sst [smem:[#allocation14_spill]] %s2191_s7  ;;  %s2193_s8 = smov (!%p32_p0, %s34_s8), %s1751_s27 }
  0x11   : > { %p1855_p3 = por %p49_p2, %p48_p1  ;;  %p54_p4 = scmp.ne.s32.totalorder %s1731_s22, %s1727_s21 }
  0x12   : > { %p36_p5 = scmp.ge.s32.totalorder %s2193_s8, 2  ;;  %p55_p6 = scmp.eq.s32.totalorder %s1344_s29, 0 }
  0x13   : > { %p208_p7 = scmp.eq.s32.totalorder %s1344_s29, 3  ;;  %p214_p8 = scmp.eq.s32.totalorder %s1345_s30, 3 }
  0x14   : > { %s2195_s8 = smov (%p36_p5, %s2193_s8), 0  ;;  %p1863_p9 = por %p55_p6, %p54_p4 }
  0x15   : > { %2169 = sst [smem:[#allocation15_spill]] %s2195_s8  ;;  %p1867_p10 = por %p208_p7, %p48_p1 }
  0x16   : > { %s38_s13 = ssub.s32 %s1751_s27, %s2195_s8  ;;  %p1873_p11 = por %p214_p8, %p54_p4 }
  0x17   : > { %s2171_s12 = scalar_select %p1867_p10, 1, 0 }
  0x18   : > { %s2172_s14 = scalar_select %p1873_p11, 1, 0 }
  0x19   : > { %p39_p12 = scmp.eq.s32.totalorder %s38_s13, 0  ;;  %p1521_p13 = scmp.lt.s32.totalorder %s1755_s28, 4 }
  0x1a   : > { %2173 = sst [smem:[#allocation16_spill]] %s2172_s14  ;;  %s234_s15 = sand.u32 1, %s1735_s23  }
  0x1b   : > { %s1880_s16 = scalar_select %p39_p12, %s1735_s23, %s41_s9  }
  0x1c   : > { %s1348_s17 = sshll.u32 %s234_s15, 3  ;;  %s1349_s18 = sshll.u32 %s1751_s27, 7 }
  0x1d   : > { %2174 = sst [smem:[#allocation17_spill]] %s1880_s16  ;;  %s2175_s0 = sld [smem:[#allocation18_spill]] }
  0x1e   : > { %s238_s30 = scalar_lea.vmem [#allocation3], %s1348_s17  ;;  %p1892_p0 = pnand %p1521_p13, %p1855_p3 }
  0x1f   : > { %s245_s8 = sshll.u32 %s238_s30, 4  ;;  %s235_s9 = scalar_lea.sflag [#allocation4], %s234_s15  ;;  %s1888_s8 = int_to_ptr.vmem [resolvable:$true] %s245_s8 }
  0x20   : > { %p1629_p5 = pneg %p1892_p0 }
  0x23   : > { %s1886_s29 = scalar_lea.hbm %s2175_s0, %s1349_s18  ;;  %s1632_s10 = scalar_lea.hbm %s2175_s0, 256 }
  0x24   : > { %s1627_s18 = scalar_lea.hbm %s1886_s29, 128  ;;  %p1633_p3 = scmp.lt.u32.totalorder %s1886_s29, %s2175_s0 }
  0x25   : > { %p1628_p4 = scmp.ne.s32.totalorder %s1886_s29, %s1627_s18  ;;  %p1634_p8 = scmp.lt.u32.totalorder %s1632_s10, %s1627_s18 }
  0x26   : > { %p1636_p13 = scmp.lt.u32.totalorder %s1627_s18, %s1886_s29 }
  0x27   : > { %p1630_p6 = pnand %p1629_p5, %p1628_p4  ;;  %p1635_p12 = por %p1634_p8, %p1633_p3 }
  0x29   : > { %p1631_p7 = pneg %p1630_p6  ;;  %p1637_p1 = por %p1636_p13, %p1635_p12 }
  0x2b   : > { %p1638_p2 = pnand %p1637_p1, %p1631_p7 }
  0x2d   : > { %1641 = shalt.err (!%p1638_p2)
}
  0x2e   : > { %s1642_s15 = scalar_lea.vmem %s1888_s8, 128  ;;  %s1757_s17 = smov [#allocation3]  }
  0x2f   : > { %p1643_p4 = scmp.ne.s32.totalorder %s1888_s8, %s1642_s15  ;;  %s1647_s19 = sshll.u32 %s1757_s17, 4  ;;  %s1648_s19 = int_to_ptr.vmem [resolvable:$false] %s1647_s19 }
  0x30   : > { %s1649_s20 = scalar_lea.vmem %s1648_s19, 256  ;;  %p1650_p10 = scmp.lt.s32.totalorder %s1888_s8, %s1648_s19 }
  0x31   : > { %p1645_p6 = pnand %p1643_p4, %p1629_p5  ;;  %p1651_p3 = scmp.lt.s32.totalorder %s1649_s20, %s1642_s15 }
  0x33   : > { %p1646_p11 = pneg %p1645_p6  ;;  %p1652_p8 = por %p1651_p3, %p1650_p10 }
  0x35   : > { %p1653_p12 = pnand %p1652_p8, %p1646_p11 }
  0x37   : > { %1656 = shalt.err (!%p1653_p12)
}
  0x38   : > { %1516 = dma.hbm_to_vmem [thread:$0]  (!%p1892_p0), %s1886_s29, 128, %s1888_s8, %s235_s9  }
  0x39   : > { %p2177_p1 = scmp.lt.s32.totalorder %s1755_s28, 5  ;;  %p2178_p2 = scmp.ge.s32.totalorder %s1755_s28, 1 }
  0x3b   : > { %p290_p5 = pnand %p2178_p2, %p2177_p1 }
  0x3c   : > { %s1928_s18 = sand.u32 (!%p290_p5), 1, %s1731_s22  }
  0x3d   : > { %293 = sbr.rel (%p290_p5) target bundleno = 2721 (0xaa1), region = 44  ;;  %s1351_s10 = sshll.u32 (!%p290_p5), %s1928_s18, 3 }
  0x3e   : > { %s296_s30 = scalar_lea.sflag (!%p290_p5), [#allocation4], %s1928_s18  ;;  %s299_s15 = scalar_lea.vmem (!%p290_p5), [#allocation3], %s1351_s10 }
  0x44   : > { %1718 = dma.done.wait (%p1863_p9), %s296_s30, 128  }
  0x45   : > { %1720 = vsyncadd (%p1863_p9), %s296_s30, 4294967168  ;;  %p352_p10 = scmp.lt.s32.totalorder %s1739_s24, 1  ;;  %s1959_s17 = scalar_lea.vmem [#allocation6], %s1351_s10 }
  0x46   : > { %p1362_p9 = scmp.ne.s32.totalorder %s1739_s24, 0 }
  0x47   : > { %s353_s8 = scalar_select %p352_p10, %s1739_s24, 1 }
  0x48   : > { %380 = sbr.rel (%p1362_p9) target bundleno = 79 (0x4f), region = 52  ;;  %v381_v0 = vld [vmem:[%s299_s15] sm:$0xff] (!%p1362_p9)  ;;  %vm382_vm0 = vcmask (!%p1362_p9), 261120  }
  0x49   : > { %s1391_s29 = sshll.u32 %s353_s8, 4  ;;  %s1394_s13 = sshll.u32 %s353_s8, 5  ;;  %383 = vst.msk [vmem:[#allocation2] sm:$0xff] (!%p1362_p9), %vm382_vm0, %v381_v0 }
  0x4a   : > { %s356_s19 = scalar_lea.vmem %s2147_s1, %s1391_s29  ;;  %s1944_s7 = scalar_lea.vmem %s2148_s2, %s1391_s29 }
  0x4b   : > { %s1949_s11 = scalar_lea.vmem %s2149_s3, %s1391_s29  ;;  %s1954_s23 = scalar_lea.vmem %s2150_s4, %s1394_s13 }
  0x4c   : > { %s1361_s22 = sshll.u32 %s353_s8, 3 }
  0x4d   : > { %s375_s9 = scalar_lea.vmem %s2151_s5, %s1361_s22 }
  0x4f PF: > { %v1597_v1 = vld [vmem:[%s356_s19] sm:$0xff]   ;;  %v1758_v2 = vmov 0.0   ;;  %v1598_v3 = vld [vmem:[%s356_s19 + $0x8] sm:$0xff]   ;;  %vm1759_vm1 = vmmov 0   ;;  %vm407_vm2 = vcmask 261120   ;;  %v391_v6 = vlaneseq  ;;  %s1760_s0 = smov 104  }
  0x50   : > { %1425 = vmatprep.subr.bf16.mxu0 %v1758_v2  ;;  %1433 = vmatprep.subr.bf16.mxu1 %v1758_v2  ;;  %v1966_v4 = vld [vmem:[#allocation2] sm:$0xff]  ;;  %s1761_s21 = smov 120   ;;  %s1762_s22 = smov 112   ;;  %vm468_vm3 = vcmask 64512   ;;  %vm715_vm4 = vcmask 1043456   ;;  %vm916_vm5 = vcmask 130048  }
  0x51   : > { %1426 = vmatpush3.bf16.msra.mxu0 %v1597_v1  ;;  %1429 = vmatprep.mubr.msk.bf16.mxu0 %vm1759_vm1, %v1758_v2  ;;  %v386_v5 = vpack.c.bf16 %v1966_v4, %v1966_v4  ;;  %v1977_v7 = vshrl.u32 %v391_v6, 7  ;;  %v1980_v9 = vld [vmem:[%s375_s9] sm:$0xff]  ;;  %s1763_s26 = smov 96   ;;  %s1764_s27 = smov 64   ;;  %vm918_vm6 = vcmask 195584   ;;  %vm1111_vm7 = vcmask 523264  }
  0x52   : > { %1427 = vmatprep.subr.bf16.mxu0 %v1758_v2  ;;  %1435 = vmatprep.mubr.msk.bf16.mxu1 %vm1759_vm1, %v1758_v2  ;;  %s1765_s14 = smov 8   ;;  %s1766_s16 = smov 16  }
  0x53   : > { %v393_v8 = vsub.s32 0, %v1977_v7  ;;  %s1767_s10 = smov 24   ;;  %p1385_p11 = scmp.ge.s32.totalorder %s1739_s24, 1 }
  0x55   : > { %1428 = vmatpush3.bf16.msra.mxu0 %v1598_v3  ;;  %v394_v10 = vrot.slane %v1980_v9, %v393_v8 }
  0x56   : > { %1439 = vmatprep.subr.bf16.mxu0 %v1758_v2 }
  0x58   : > { %1430 = vmatmul.mubr.msk.bf16.vlgmr.msra.gmra.mrb[0].mxu0 %vm407_vm2, %v386_v5 }
  0x59   : > { %1441 = vmatprep.mubr.msk.bf16.mxu0 %vm1759_vm1, %v1758_v2 }
 0x12b   : > { %v445_v11 = vpop.f32.mrb[0].mxu0 }
 0x12c   : > { %v446_v12 = vadd.f32 %v445_v11, %v394_v10  ;;  %v1431_v13 = vpop.f32.mrb[1].mxu0 }
 0x12d   : > { %v448_v14 = vpop.f32.mrb[2].mxu0 }
 0x12e   : > { %458 = vrot.lane.b32.xlu1 %v446_v12, %s1760_s0  ;;  %452 = vrot.lane.b32.xlu0 %v446_v12, %s1761_s21  ;;  %v1432_v15 = vpop.f32.mrb[3].mxu0  ;;  %v1983_v16 = vpack.c.bf16 %v446_v12, %v446_v12 }
 0x132   : > { %455 = vrot.lane.b32.xlu0 %v446_v12, %s1762_s22  ;;  %466 = vrot.lane.b32.xlu1 %v1983_v16, %s1763_s26 }
 0x1a0   : > { %v459_v17 = vpop.permute.xlu1 %458  ;;  %v453_v18 = vpop.permute.xlu0 %452 }
 0x1a1   : > { %v462_v19 = vpack.c.bf16 %v453_v18, %v453_v18  ;;  %v1986_v22 = vpack.c.bf16 %v459_v17, %v459_v17 }
 0x1a3   : > { %516 = vrot.lane.b32.xlu0 %v462_v19, %s1763_s26 }
 0x1a4   : > { %v456_v20 = vpop.permute.xlu0 %455  ;;  %v467_v21 = vpop.permute.xlu1 %466 }
 0x1a5   : > { %v1988_v23 = vpack.c.bf16 %v456_v20, %v456_v20  ;;  %v473_v24 = vsel %vm468_vm3, %v467_v21, 0 }
 0x1a6   : > { %1434 = vmatpush3.bf16.xpose.msra.mxu1 %v473_v24 }
 0x1a7   : > { %614 = vrot.lane.b32.xlu0 %v1986_v22, %s1763_s26  ;;  %565 = vrot.lane.b32.xlu1 %v1988_v23, %s1763_s26 }
 0x1a8   : > { %1445 = vmatprep.subr.bf16.mxu1 %v1758_v2 }
 0x1ad   : > { %1436 = vmatmul.mubr.msk.bf16.vlgmr.msra.gmra.mrb[0].mxu1 %vm468_vm3, %v1983_v16 }
 0x1ae   : > { %1447 = vmatprep.mubr.msk.bf16.mxu1 %vm1759_vm1, %v1758_v2 }
 0x215   : > { %v517_v25 = vpop.permute.xlu0 %516 }
 0x216   : > { %v522_v26 = vsel %vm468_vm3, %v517_v25, 0 }
 0x217   : > { %1440 = vmatpush3.bf16.xpose.msra.mxu0 %v522_v26 }
 0x218   : > { %1451 = vmatprep.subr.bf16.mxu0 %v1758_v2 }
 0x219   : > { %v566_v27 = vpop.permute.xlu1 %565  ;;  %v615_v29 = vpop.permute.xlu0 %614 }
 0x21a   : > { %v571_v28 = vsel %vm468_vm3, %v566_v27, 0  ;;  %v620_v30 = vsel %vm468_vm3, %v615_v29, 0 }
 0x21b   : > { %1446 = vmatpush3.bf16.xpose.msra.mxu1 %v571_v28 }
 0x21c   : > { %1457 = vmatprep.subr.bf16.mxu1 %v1758_v2 }
 0x21e   : > { %1442 = vmatmul.mubr.msk.bf16.vlgmr.msra.gmra.mrb[4].mxu0 %vm468_vm3, %v462_v19 }
 0x21f   : > { %1452 = vmatpush3.bf16.xpose.msra.mxu0 %v620_v30  ;;  %1453 = vmatprep.mubr.msk.bf16.mxu0 %vm1759_vm1, %v1758_v2 }
 0x220   : > { %1463 = vmatprep.subr.bf16.mxu0 %v1758_v2 }
 0x222   : > { %1448 = vmatmul.mubr.msk.bf16.vlgmr.msra.gmra.mrb[4].mxu1 %vm468_vm3, %v1988_v23 }
 0x223   : > { %1459 = vmatprep.mubr.msk.bf16.mxu1 %vm1759_vm1, %v1758_v2 }
 0x226   : > { %1454 = vmatmul.mubr.msk.bf16.vlgmr.msra.gmra.mrb[8].mxu0 %vm468_vm3, %v1986_v22 }
 0x227   : > { %1465 = vmatprep.mubr.msk.bf16.mxu0 %vm1759_vm1, %v1758_v2 }
 0x280   : > { %v509_v31 = vpop.f32.mrb[0].mxu1 }
 0x281   : > { %v1437_v32 = vpop.f32.mrb[1].mxu1  ;;  %v662_v33 = vsel %vm468_vm3, %v509_v31, -inf }
 0x282   : > { %663 = vmax.xlane.f32.xlu1 %v662_v33  ;;  %v512_v34 = vpop.f32.mrb[2].mxu1 }
 0x283   : > { %v1438_v35 = vpop.f32.mrb[3].mxu1 }
 0x2f1   : > { %v558_v36 = vpop.f32.mrb[4].mxu0 }
 0x2f2   : > { %v1443_v37 = vpop.f32.mrb[5].mxu0  ;;  %v665_v38 = vsel %vm468_vm3, %v558_v36, -inf }
 0x2f3   : > { %666 = vmax.xlane.f32.xlu0 %v665_v38  ;;  %v561_v39 = vpop.f32.mrb[6].mxu0 }
 0x2f4   : > { %v1444_v40 = vpop.f32.mrb[7].mxu0  ;;  %v1599_v39 = vld [vmem:[%s1944_s7] sm:$0xff]  }
 0x2f5   : > { %v607_v41 = vpop.f32.mrb[4].mxu1  ;;  %v1600_v40 = vld [vmem:[%s1944_s7 + $0x8] sm:$0xff]  }
 0x2f6   : > { %v1449_v42 = vpop.f32.mrb[5].mxu1  ;;  %v668_v43 = vsel %vm468_vm3, %v607_v41, -inf }
 0x2f7   : > { %v610_v44 = vpop.f32.mrb[6].mxu1  ;;  %669 = vmax.xlane.f32.xlu0 %v668_v43 }
 0x2f8   : > { %v1450_v45 = vpop.f32.mrb[7].mxu1 }
 0x2f9   : > { %v656_v46 = vpop.f32.mrb[8].mxu0 }
 0x2fa   : > { %v1455_v47 = vpop.f32.mrb[9].mxu0  ;;  %v671_v48 = vsel %vm468_vm3, %v656_v46, -inf }
 0x2fb   : > { %672 = vmax.xlane.f32.xlu1 %v671_v48  ;;  %v659_v49 = vpop.f32.mrb[10].mxu0 }
 0x2fc   : > { %v1456_v50 = vpop.f32.mrb[11].mxu0 }
 0x30c   : > { %759 = vrot.lane.b32.xlu1 %v462_v19, %s1764_s27 }
 0x30d   : > { %710 = vrot.lane.b32.xlu0 %v1983_v16, %s1764_s27 }
 0x30f   : > { %v664_v51 = vpop.xlane.xlu1 %663 }
 0x310   : > { %v674_v52 = vsub.f32 %v509_v31, %v664_v51 }
 0x312   : > { %v678_v53 = vmul.f32 1.442695, %v674_v52 }
 0x314   : > { %1607 = vpow2.f32 %v678_v53 }
 0x31e   : > { %v1608_v54 = vpop.eup %1607 }
 0x31f   : > { %v686_v55 = vsel %vm468_vm3, %v1608_v54, 0.0 }
 0x32c   : > { %687 = vadd.xlane.f32.xlu0 %v686_v55 }
 0x380   : > { %v667_v56 = vpop.xlane.xlu0 %666 }
 0x381   : > { %v675_v57 = vsub.f32 %v558_v36, %v667_v56 }
 0x383   : > { %v680_v58 = vmul.f32 1.442695, %v675_v57 }
 0x384   : > { %v670_v59 = vpop.xlane.xlu0 %669 }
 0x385   : > { %1609 = vpow2.f32 %v680_v58  ;;  %v676_v60 = vsub.f32 %v607_v41, %v670_v59 }
 0x387   : > { %v682_v61 = vmul.f32 1.442695, %v676_v60  ;;  %v927_v60 = vsub.s32 1, %v1977_v7 }
 0x388   : > { %v711_v62 = vpop.permute.xlu0 %710  ;;  %v673_v63 = vpop.xlane.xlu1 %672 }
 0x389   : > { %1611 = vpow2.f32 %v682_v61  ;;  %v717_v0 = vsel %vm715_vm4, %v711_v62, 0  ;;  %v677_v1 = vsub.f32 %v656_v46, %v673_v63  ;;  %v928_v61 = vrot.slane %v1980_v9, %v927_v60 }
 0x38a   : > { %1458 = vmatpush3.bf16.msra.mxu1 %v717_v0 }
 0x38b   : > { %v684_v3 = vmul.f32 1.442695, %v677_v1  ;;  %1469 = vmatprep.subr.bf16.mxu1 %v1758_v2 }
 0x38c   : > { %v760_v5 = vpop.permute.xlu1 %759 }
 0x38d   : > { %1613 = vpow2.f32 %v684_v3  ;;  %v765_v6 = vsel %vm715_vm4, %v760_v5, 0 }
 0x38e   : > { %1464 = vmatpush3.bf16.msra.mxu0 %v765_v6 }
 0x38f   : > { %v1610_v8 = vpop.eup %1609  ;;  %1475 = vmatprep.subr.bf16.mxu0 %v1758_v2 }
 0x390   : > { %v689_v10 = vsel %vm468_vm3, %v1610_v8, 0.0 }
 0x391   : > { %690 = vadd.xlane.f32.xlu1 %v689_v10 }
 0x393   : > { %v1612_v11 = vpop.eup %1611 }
 0x394   : > { %v692_v12 = vsel %vm468_vm3, %v1612_v11, 0.0 }
 0x395   : > { %693 = vadd.xlane.f32.xlu0 %v692_v12 }
 0x397   : > { %v1614_v13 = vpop.eup %1613 }
 0x398   : > { %v695_v14 = vsel %vm468_vm3, %v1614_v13, 0.0 }
 0x399   : > { %696 = vadd.xlane.f32.xlu1 %v695_v14  ;;  %v1601_v14 = vld [vmem:[%s1949_s11] sm:$0xff]  }
 0x3aa   : > { %807 = vrot.lane.b32.xlu1 %v1988_v23, %s1764_s27 }
 0x3ab   : > { %855 = vrot.lane.b32.xlu0 %v1986_v22, %s1764_s27 }
 0x3b9   : > { %v688_v15 = vpop.xlane.xlu0 %687 }
 0x3ba   : > { %1615 = vrcp.f32 %v688_v15  ;;  %v1602_v15 = vld [vmem:[%s1949_s11 + $0x8] sm:$0xff]  }
 0x3c4   : > { %v1616_v16 = vpop.eup %1615 }
 0x3c5   : > { %v702_v17 = vmul.f32 %v1616_v16, %v1608_v54  ;;  %v1603_v16 = vld [vmem:[%s1954_s23] sm:$0xff]  }
 0x3c7   : > { %v706_v18 = vpack.c.bf16 %v702_v17, %v702_v17 }
 0x3c9   : > { %1460 = vmatmul.mubr.msk.bf16.vlgmr.msra.gmra.mrb[8].mxu1 %vm468_vm3, %v706_v18 }
 0x3ca   : > { %1471 = vmatprep.mubr.msk.bf16.mxu1 %vm1759_vm1, %v1758_v2 }
 0x41e   : > { %v691_v19 = vpop.xlane.xlu1 %690 }
 0x41f   : > { %1617 = vrcp.f32 %v691_v19 }
 0x422   : > { %v694_v20 = vpop.xlane.xlu0 %693 }
 0x423   : > { %1619 = vrcp.f32 %v694_v20  ;;  %v1001_v20 = vsub.s32 2, %v1977_v7 }
 0x426   : > { %v697_v21 = vpop.xlane.xlu1 %696  ;;  %v856_v22 = vpop.permute.xlu0 %855 }
 0x427   : > { %1621 = vrcp.f32 %v697_v21  ;;  %v861_v30 = vsel %vm715_vm4, %v856_v22, 0  ;;  %v1006_v21 = vsub.s32 3, %v1977_v7 }
 0x429   : > { %v1618_v23 = vpop.eup %1617  ;;  %v1007_v22 = vrot.slane %v1980_v9, %v1006_v21 }
 0x42a   : > { %v703_v24 = vmul.f32 %v1618_v23, %v1610_v8  ;;  %v808_v25 = vpop.permute.xlu1 %807  ;;  %v1002_v23 = vrot.slane %v1980_v9, %v1001_v20 }
 0x42b   : > { %v813_v26 = vsel %vm715_vm4, %v808_v25, 0 }
 0x42c   : > { %1470 = vmatpush3.bf16.msra.mxu1 %v813_v26  ;;  %v707_v27 = vpack.c.bf16 %v703_v24, %v703_v24 }
 0x42d   : > { %v1620_v28 = vpop.eup %1619  ;;  %1481 = vmatprep.subr.bf16.mxu1 %v1758_v2 }
 0x42e   : > { %v704_v29 = vmul.f32 %v1620_v28, %v1612_v11  ;;  %1466 = vmatmul.mubr.msk.bf16.vlgmr.msra.gmra.mrb[12].mxu0 %vm468_vm3, %v707_v27 }
 0x42f   : > { %1476 = vmatpush3.bf16.msra.mxu0 %v861_v30  ;;  %1477 = vmatprep.mubr.msk.bf16.mxu0 %vm1759_vm1, %v1758_v2  ;;  %v1606_v30 = vld [vmem:[%s1954_s23 + $0x18] sm:$0xff]  }
 0x430   : > { %v708_v31 = vpack.c.bf16 %v704_v29, %v704_v29  ;;  %1489 = vmatprep.subr.bf16.mxu0 %v1758_v2  ;;  %v1605_v29 = vld [vmem:[%s1954_s23 + $0x10] sm:$0xff]  }
 0x431   : > { %v1622_v32 = vpop.eup %1621 }
 0x432   : > { %v705_v33 = vmul.f32 %v1622_v32, %v1614_v13  ;;  %1472 = vmatmul.mubr.msk.bf16.vlgmr.msra.gmra.mrb[12].mxu1 %vm468_vm3, %v708_v31  ;;  %v1016_v31 = vsub.s32 4, %v1977_v7 }
 0x433   : > { %1485 = vmatprep.mubr.msk.bf16.mxu1 %vm1759_vm1, %v1758_v2  ;;  %1482 = vmatpush3.bf16.msra.mxu1 %v1599_v39 }
 0x434   : > { %v709_v34 = vpack.c.bf16 %v705_v33, %v705_v33  ;;  %1483 = vmatprep.subr.bf16.mxu1 %v1758_v2  ;;  %v1017_v32 = vrot.slane %v1980_v9, %v1016_v31 }
 0x436   : > { %1478 = vmatmul.mubr.msk.bf16.vlgmr.msra.gmra.mrb[16].mxu0 %vm468_vm3, %v709_v34 }
 0x437   : > { %1493 = vmatprep.mubr.msk.bf16.mxu0 %vm1759_vm1, %v1758_v2  ;;  %1484 = vmatpush3.bf16.msra.mxu1 %v1600_v40  ;;  %v1085_v40 = vsub.s32 5, %v1977_v7 }
 0x438   : > { %1497 = vmatprep.subr.bf16.mxu1 %v1758_v2  ;;  %1490 = vmatpush3.bf16.msra.mxu0 %v1601_v14 }
 0x439   : > { %1491 = vmatprep.subr.bf16.mxu0 %v1758_v2 }
 0x43c   : > { %1492 = vmatpush3.bf16.msra.mxu0 %v1602_v15 }
 0x49c   : > { %v753_v35 = vpop.f32.mrb[8].mxu1 }
 0x49d   : > { %v1461_v36 = vpop.f32.mrb[9].mxu1 }
 0x49e   : > { %v756_v37 = vpop.f32.mrb[10].mxu1 }
 0x49f   : > { %v1462_v38 = vpop.f32.mrb[11].mxu1 }
 0x501   : > { %v801_v41 = vpop.f32.mrb[12].mxu0 }
 0x502   : > { %904 = vrot.lane.b32.xlu1 %v801_v41, %s1765_s14  ;;  %v1467_v42 = vpop.f32.mrb[13].mxu0  ;;  %v1086_v41 = vrot.slane %v1980_v9, %v1085_v40 }
 0x503   : > { %v804_v43 = vpop.f32.mrb[14].mxu0 }
 0x504   : > { %v1468_v44 = vpop.f32.mrb[15].mxu0 }
 0x505   : > { %v849_v45 = vpop.f32.mrb[12].mxu1 }
 0x506   : > { %908 = vrot.lane.b32.xlu0 %v849_v45, %s1766_s16  ;;  %v1473_v46 = vpop.f32.mrb[13].mxu1 }
 0x507   : > { %v852_v47 = vpop.f32.mrb[14].mxu1 }
 0x508   : > { %v1474_v48 = vpop.f32.mrb[15].mxu1 }
 0x509   : > { %v897_v49 = vpop.f32.mrb[16].mxu0 }
 0x50a   : > { %912 = vrot.lane.b32.xlu1 %v897_v49, %s1767_s10  ;;  %v1479_v50 = vpop.f32.mrb[17].mxu0 }
 0x50b   : > { %v900_v51 = vpop.f32.mrb[18].mxu0 }
 0x50c   : > { %v1480_v52 = vpop.f32.mrb[19].mxu0 }
 0x574   : > { %v905_v53 = vpop.permute.xlu1 %904 }
 0x575   : > { %v915_v55 = vsel %vm468_vm3, %v753_v35, %v905_v53 }
 0x578   : > { %v909_v54 = vpop.permute.xlu0 %908 }
 0x579   : > { %v917_v56 = vsel %vm916_vm5, %v915_v55, %v909_v54 }
 0x57c   : > { %v913_v57 = vpop.permute.xlu1 %912 }
 0x57d   : > { %v919_v58 = vsel %vm918_vm6, %v917_v56, %v913_v57  ;;  %v1171_v56 = vsub.s32 6, %v1977_v7  ;;  %v1176_v57 = vsub.s32 7, %v1977_v7 }
 0x57e   : > { %v920_v59 = vpack.c.bf16 %v919_v58, %v919_v58 }
 0x57f   : > { %v1172_v58 = vrot.slane %v1980_v9, %v1171_v56  ;;  %v1177_v60 = vrot.slane %v1980_v9, %v1176_v57 }
 0x580   : > { %1486 = vmatmul.mubr.msk.bf16.vlgmr.msra.gmra.mrb[16].mxu1 %vm407_vm2, %v920_v59 }
 0x581   : > { %1505 = vmatprep.mubr.msk.bf16.mxu1 %vm1759_vm1, %v1758_v2  ;;  %1498 = vmatpush3.bf16.msra.mxu1 %v1603_v16 }
 0x582   : > { %1499 = vmatprep.subr.bf16.mxu1 %v1758_v2 }
 0x653   : > { %v978_v62 = vpop.f32.mrb[16].mxu1 }
 0x654   : > { %v979_v63 = vadd.f32 %v978_v62, %v928_v61  ;;  %v1487_v0 = vpop.f32.mrb[17].mxu1 }
 0x655   : > { %v981_v1 = vpop.f32.mrb[18].mxu1 }
 0x656   : > { %v1488_v3 = vpop.f32.mrb[19].mxu1  ;;  %v984_v5 = vadd.f32 %v979_v63, %v1966_v4  ;;  %v1604_v4 = vld [vmem:[%s1954_s23 + $0x8] sm:$0xff]  }
 0x657   : > { %1500 = vmatpush3.bf16.msra.mxu1 %v1604_v4 }
 0x658   : > { %v985_v6 = vsel %vm407_vm2, %v984_v5, 0.0  ;;  %1501 = vmatprep.subr.bf16.mxu1 %v1758_v2 }
 0x659   : > { %986 = vadd.xlane.f32.xlu0 %v985_v6 }
 0x65b   : > { %1502 = vmatpush3.bf16.msra.mxu1 %v1605_v29 }
 0x65c   : > { %1503 = vmatprep.subr.bf16.mxu1 %v1758_v2 }
 0x65f   : > { %1504 = vmatpush3.bf16.msra.mxu1 %v1606_v30 }
 0x6e6   : > { %v987_v8 = vpop.xlane.xlu0 %986 }
 0x6e7   : > { %v989_v10 = vmul.f32 0.03125, %v987_v8 }
 0x6e9   : > { %v990_v11 = vsub.f32 %v984_v5, %v989_v10 }
 0x6eb   : > { %v991_v12 = vmul.f32 %v990_v11, %v990_v11 }
 0x6ed   : > { %v992_v13 = vsel %vm407_vm2, %v991_v12, 0.0 }
 0x6ee   : > { %993 = vadd.xlane.f32.xlu1 %v992_v13 }
 0x77b   : > { %v994_v17 = vpop.xlane.xlu1 %993 }
 0x77c   : > { %v995_v18 = vmul.f32 0.03125, %v994_v17 }
 0x77e   : > { %v996_v19 = vadd.f32 1e-05, %v995_v18 }
 0x780   : > { %1623 = vrsqrt.f32 %v996_v19 }
 0x78a   : > { %v1624_v24 = vpop.eup %1623 }
 0x78b   : > { %v998_v25 = vmul.f32 %v1624_v24, %v990_v11 }
 0x78d   : > { %v1003_v26 = vmul.f32 %v1002_v23, %v998_v25 }
 0x78f   : > { %v1008_v27 = vadd.f32 %v1007_v22, %v1003_v26 }
 0x791   : > { %v1009_v28 = vpack.c.bf16 %v1008_v27, %v1008_v27 }
 0x793   : > { %1494 = vmatmul.mubr.msk.bf16.vlgmr.msra.gmra.mrb[20].mxu0 %vm407_vm2, %v1009_v28 }
 0x866   : > { %v1067_v33 = vpop.f32.mrb[20].mxu0 }
 0x867   : > { %v1068_v34 = vadd.f32 %v1067_v33, %v1017_v32  ;;  %v1495_v35 = vpop.f32.mrb[21].mxu0 }
 0x868   : > { %v1070_v36 = vpop.f32.mrb[22].mxu0 }
 0x869   : > { %v1073_v37 = vmax.f32 %v1068_v34, 0.0  ;;  %v1496_v38 = vpop.f32.mrb[23].mxu0 }
 0x86b   : > { %v1074_v39 = vpack.c.bf16 %v1073_v37, %v1073_v37 }
 0x86d   : > { %1506 = vmatmul.mubr.msk.bf16.vlgmr.msra.gmra.mrb[20].mxu1 %vm1111_vm7, %v1074_v39 }
 0x940   : > { %v1149_v2 = vpop.f32.mrb[20].mxu1 }
 0x941   : > { %v1150_v42 = vadd.f32 %v1149_v2, %v1086_v41  ;;  %v1507_v43 = vpop.f32.mrb[21].mxu1 }
 0x942   : > { %v1152_v44 = vpop.f32.mrb[22].mxu1 }
 0x943   : > { %v1508_v45 = vpop.f32.mrb[23].mxu1  ;;  %v1155_v46 = vadd.f32 %v1150_v42, %v1008_v27 }
 0x945   : > { %v1156_v47 = vsel %vm407_vm2, %v1155_v46, 0.0 }
 0x946   : > { %1157 = vadd.xlane.f32.xlu0 %v1156_v47 }
 0x9d3   : > { %v1158_v48 = vpop.xlane.xlu0 %1157 }
 0x9d4   : > { %v1159_v49 = vmul.f32 0.03125, %v1158_v48 }
 0x9d6   : > { %v1160_v50 = vsub.f32 %v1155_v46, %v1159_v49 }
 0x9d8   : > { %v1161_v51 = vmul.f32 %v1160_v50, %v1160_v50 }
 0x9da   : > { %v1162_v52 = vsel %vm407_vm2, %v1161_v51, 0.0 }
 0x9db   : > { %1163 = vadd.xlane.f32.xlu0 %v1162_v52 }
 0xa68   : > { %v1164_v53 = vpop.xlane.xlu0 %1163 }
 0xa69   : > { %v1165_v54 = vmul.f32 0.03125, %v1164_v53 }
 0xa6b   : > { %v1166_v55 = vadd.f32 1e-05, %v1165_v54 }
 0xa6d   : > { %1625 = vrsqrt.f32 %v1166_v55 }
 0xa76   : > { %1182 = sbr.rel (%p1385_p11) target bundleno = 2687 (0xa7f), region = 56 }
 0xa77   : > { %v1626_v59 = vpop.eup %1625 }
 0xa78   : > { %v1168_v61 = vmul.f32 %v1626_v59, %v1160_v50 }
 0xa7a   : > { %v1173_v62 = vmul.f32 %v1172_v58, %v1168_v61 }
 0xa7c   : > { %v1178_v63 = vadd.f32 %v1177_v60, %v1173_v62 }
 0xa7e   : > { %1183 = vst.msk [vmem:[#allocation2] sm:$0xff] %vm407_vm2, %v1178_v63 }
 0xa7f PF: > { %p1386_p0 = scmp.ne.s32.totalorder %s1739_s24, 1 }
 0xa80   : > { %1188 = vst.msk [vmem:[%s1959_s17] sm:$0xff] (!%p1386_p0), %vm407_vm2, %v1178_v63 }
 0xa81   : > { %1187 = sbr.rel (%p1386_p0) target bundleno = 2696 (0xa88), region = 60 }
 0xa88 PF: > { %s1388_s23 = sshll.u32 %s1743_s25, 7  ;;  %s1203_s29 = sshll.u32 %s1959_s17, 4  ;;  %s1204_s29 = int_to_ptr.vmem [resolvable:$true] %s1203_s29 }
 0xa89   : > { %s2097_s8 = scalar_lea.hbm %s2152_s6, %s1388_s23  ;;  %s1190_s13 = scalar_lea.sflag [#allocation5], %s1928_s18 }
 0xa8a   : > { %s1657_s19 = scalar_lea.vmem %s1204_s29, 128  ;;  %p2179_p13 = scmp.ne.s32.totalorder %s2171_s12, 0 }
 0xa8b   : > { %p1658_p7 = scmp.ne.s32.totalorder %s1204_s29, %s1657_s19  ;;  %s1768_s24 = smov [#allocation6]  }
 0xa8c   : > { %s1661_s20 = sshll.u32 %s1768_s24, 4  ;;  %s1662_s20 = int_to_ptr.vmem [resolvable:$false] %s1661_s20 }
 0xa8d   : > { %p1659_p4 = pnand %p1658_p7, %p2179_p13  ;;  %s1663_s11 = scalar_lea.vmem %s1662_s20, 256 }
 0xa8e   : > { %p1664_p3 = scmp.lt.s32.totalorder %s1204_s29, %s1662_s20  ;;  %p1665_p8 = scmp.lt.s32.totalorder %s1663_s11, %s1657_s19 }
 0xa8f   : > { %p1660_p6 = pneg %p1659_p4 }
 0xa90   : > { %p1666_p12 = por %p1665_p8, %p1664_p3 }
 0xa92   : > { %p1667_p1 = pnand %p1666_p12, %p1660_p6 }
 0xa94   : > { %1670 = shalt.err (!%p1667_p1)
}
 0xa95   : > { %s1671_s25 = scalar_lea.hbm %s2097_s8, 128  ;;  %s1675_s9 = scalar_lea.hbm %s2152_s6, 256 }
 0xa96   : > { %p1672_p2 = scmp.ne.s32.totalorder %s2097_s8, %s1671_s25  ;;  %p1676_p9 = scmp.lt.u32.totalorder %s2097_s8, %s2152_s6 }
 0xa97   : > { %p1677_p11 = scmp.lt.u32.totalorder %s1675_s9, %s1671_s25  ;;  %p1679_p7 = scmp.lt.u32.totalorder %s1671_s25, %s2097_s8 }
 0xa98   : > { %p1673_p5 = pnand %p1672_p2, %p2179_p13 }
 0xa99   : > { %p1678_p0 = por %p1677_p11, %p1676_p9 }
 0xa9a   : > { %p1674_p10 = pneg %p1673_p5 }
 0xa9b   : > { %p1680_p4 = por %p1679_p7, %p1678_p0 }
 0xa9d   : > { %p1681_p6 = pnand %p1680_p4, %p1674_p10 }
 0xa9f   : > { %1684 = shalt.err (!%p1681_p6)
}
 0xaa0   : > { %1511 = dma.vmem_to_hbm [thread:$0]  (%p2179_p13), %s1204_s29, 128, %s2097_s8, %s1190_s13  }
 0xaa1 PF: > { %s2180_s21 = sld [smem:[#allocation9_spill]]  ;;  %s2181_s22 = sld [smem:[#allocation16_spill]] }
 0xaa2   : > { %p1522_p3 = scmp.ge.s32.totalorder %s1755_s28, 2 }
 0xaa7   : > { %s1215_s26 = sand.u32 1, %s2180_s21   ;;  %p2182_p8 = scmp.ne.s32.totalorder %s2181_s22, 0 }
 0xaa8   : > { %s1216_s27 = scalar_lea.sflag [#allocation5], %s1215_s26 }
 0xaa9   : > { %p1518_p12 = pnand %p1522_p3, %p2182_p8 }
 0xaab   : > { %1722 = dma.done.wait (!%p1518_p12), %s1216_s27, 128  }
 0xaac   : > { %1724 = vsyncadd (!%p1518_p12), %s1216_s27, 4294967168  ;;  %s22_s28 = sadd.s32 1, %s1755_s28   ;;  %s2183_s21 = sld [smem:[#allocation10_spill]] }
 0xaad   : > { %p19_p1 = scmp.ge.s32.totalorder %s22_s28, 6   ;;  %s2184_s22 = sld [smem:[#allocation11_spill]] }
 0xaae   : > { %s2185_s23 = sld [smem:[#allocation17_spill]]  ;;  %s2186_s24 = sld [smem:[#allocation12_spill]] }
 0xaaf   : > { %s2187_s25 = sld [smem:[#allocation13_spill]]  ;;  %s2188_s26 = sld [smem:[#allocation14_spill]] }
 0xab0   : > { %s2189_s27 = sld [smem:[#allocation15_spill]]  ;;  %21 = sbr.rel (!%p19_p1) target bundleno = 9 (0x9), region = 116 }
 0xab7   :  { %1221 = vsyncpa [#allocation4], 1 }
 0xab8   :  { %1223 = vsyncpa [#allocation4 + $0x1], 1 }
 0xab9   :  { %1224 = vsyncpa [#allocation5], 1 }
 0xaba   :  { %1226 = vsyncpa [#allocation5 + $0x1], 1 }

</bundles_post_ra>
